<compile_context>
chip_gen: v5e
topology: v5e:2x2
jax: 0.10.0
libtpu: 0.0.40
codegen_flags: <defaults>
</compile_context>

<pallas_src>
import functools

import jax
import jax.numpy as jnp
from jax.experimental import pallas as pl
from jax.experimental.pallas import tpu as pltpu

CRITIC_LAYER_SIZE = 70
SCALE_FACTOR = -5000
NEG_SLOPE = 0.01          # torch.nn.LeakyReLU default

F_IN = 6
F_PAD = 8                 # sublane-aligned feature dim
H_PAD = 128               # lane/sublane-aligned hidden dim
MAX_TILE = 2048           # lanes per grid step (f32 activations ~1 MiB / tile)


def _leaky_relu(x):
    return jnp.where(x > 0, x, NEG_SLOPE * x)


def critic_kernel(x_ref, w1t_ref, b1_ref, w2t_ref, b2_ref, w3_ref, b3_ref,
                  o_ref, *, scale_factor):
    # x_ref: (F_PAD, tb) f32 -- batch on lanes.
    xb = x_ref[...].astype(jnp.bfloat16)

    # Layer 1: (H_PAD, F_PAD) @ (F_PAD, tb) -> (H_PAD, tb), f32 accumulate.
    h = jnp.dot(w1t_ref[...], xb, preferred_element_type=jnp.float32)
    h = _leaky_relu(h + b1_ref[...])

    # Layer 2: (H_PAD, H_PAD) @ (H_PAD, tb) -> (H_PAD, tb).
    h = jnp.dot(w2t_ref[...], h.astype(jnp.bfloat16),
                preferred_element_type=jnp.float32)
    h = _leaky_relu(h + b2_ref[...])

    # Layer 3 (H_PAD -> 1): VPU broadcast-multiply + sublane reduce (XLU)
    # instead of an N=1 MXU pass; b3 is a scalar read from SMEM.
    v = jnp.sum(h * w3_ref[...], axis=0, keepdims=True) + b3_ref[0]   # (1, tb)

    v = jnp.tanh(-(v * v)) * scale_factor
    o_ref[...] = v.astype(o_ref.dtype)                                 # lane-dense store


def _default_batch_tile(b_pad):
    # Largest multiple of 128 dividing b_pad, capped at MAX_TILE; prefer >= 2
    # grid steps (so v7x can shard the parallel axis across both TCs).
    cap = min(MAX_TILE, b_pad if b_pad < 256 else b_pad // 2)
    tb = 128
    for d in range(128, cap + 1, 128):
        if b_pad % d == 0:
            tb = d
    return tb


def critic_forward(x, params, *, scale_factor=SCALE_FACTOR, batch_tile=None):
    """x: (B, 6) float32 -> (B, 1) float32."""
    w1, b1, w2, b2, w3, b3 = params
    B, F = x.shape
    H = w1.shape[1]
    assert F == F_IN and H <= H_PAD

    b_pad = max(128, ((B + 127) // 128) * 128)
    tb = _default_batch_tile(b_pad) if batch_tile is None else int(batch_tile)
    # Guardrail: lane dim must be a multiple of 128 and divide the padded batch.
    assert tb % 128 == 0 and b_pad % tb == 0, (tb, b_pad)

    # Layout plumbing (cheap XLA ops outside the kernel): transpose to
    # batch-on-lanes, zero-pad features 6->8, hidden 70->128, batch -> b_pad,
    # and cast matmul weights to bf16 (f32 accumulation inside the kernel).
    xt  = jnp.pad(x.astype(jnp.float32).T, ((0, F_PAD - F), (0, b_pad - B)))
    w1t = jnp.pad(w1.T, ((0, H_PAD - H), (0, F_PAD - F))).astype(jnp.bfloat16)
    w2t = jnp.pad(w2.T, ((0, H_PAD - H), (0, H_PAD - H))).astype(jnp.bfloat16)
    b1c = jnp.pad(jnp.reshape(b1, (H, 1)), ((0, H_PAD - H), (0, 0))).astype(jnp.float32)
    b2c = jnp.pad(jnp.reshape(b2, (H, 1)), ((0, H_PAD - H), (0, 0))).astype(jnp.float32)
    w3c = jnp.pad(jnp.reshape(w3, (H, 1)), ((0, H_PAD - H), (0, 0))).astype(jnp.float32)
    b3s = jnp.reshape(b3, (1,)).astype(jnp.float32)

    grid = (b_pad // tb,)
    kernel = functools.partial(critic_kernel, scale_factor=float(scale_factor))

    out_t = pl.pallas_call(
        kernel,
        out_shape=jax.ShapeDtypeStruct((1, b_pad), jnp.float32),
        grid_spec=pltpu.PrefetchScalarGridSpec(
            num_scalar_prefetch=0,
            grid=grid,
            in_specs=[
                pl.BlockSpec((F_PAD, tb), lambda i: (0, i)),         # x^T tile
                pl.BlockSpec((H_PAD, F_PAD), lambda i: (0, 0)),      # W1^T (resident)
                pl.BlockSpec((H_PAD, 1), lambda i: (0, 0)),          # b1 column
                pl.BlockSpec((H_PAD, H_PAD), lambda i: (0, 0)),      # W2^T (resident)
                pl.BlockSpec((H_PAD, 1), lambda i: (0, 0)),          # b2 column
                pl.BlockSpec((H_PAD, 1), lambda i: (0, 0)),          # w3 column
                pl.BlockSpec(memory_space=pltpu.MemorySpace.SMEM),   # b3 scalar
            ],
            out_specs=pl.BlockSpec((1, tb), lambda i: (0, i)),       # lane-dense out
        ),
        compiler_params=pltpu.CompilerParams(
            dimension_semantics=("parallel",)),
    )(xt, w1t, b1c, w2t, b2c, w3c, b3s)

    return out_t[:, :B].T           # (B, 1), drop batch padding


def init_params(key, hidden=CRITIC_LAYER_SIZE):
    """Deterministic init mimicking torch.nn.Linear default U(-1/sqrt(fan_in), +)."""
    def linear(k, fan_in, fan_out):
        kw, kb = jax.random.split(k)
        bound = 1.0 / jnp.sqrt(float(fan_in))
        w = jax.random.uniform(kw, (fan_in, fan_out), jnp.float32, -bound, bound)
        b = jax.random.uniform(kb, (1, fan_out), jnp.float32, -bound, bound)
        return w, b

    k1, k2, k3 = jax.random.split(key, 3)
    w1, b1 = linear(k1, F_IN, hidden)
    w2, b2 = linear(k2, hidden, hidden)
    w3, b3 = linear(k3, hidden, 1)
    return w1, b1, w2, b2, w3, b3


def reference_forward(x, params, scale_factor=SCALE_FACTOR):
    """Pure-JAX reference mirroring the kernel numerics (bf16 MXU operands,
    f32 accumulation; bias / LeakyReLU / final layer / tanh in f32)."""
    w1, b1, w2, b2, w3, b3 = params
    h = jnp.dot(x.astype(jnp.bfloat16), w1.astype(jnp.bfloat16),
                preferred_element_type=jnp.float32) + b1
    h = _leaky_relu(h)
    h = jnp.dot(h.astype(jnp.bfloat16), w2.astype(jnp.bfloat16),
                preferred_element_type=jnp.float32) + b2
    h = _leaky_relu(h)
    v = h @ w3 + b3
    return jnp.tanh(-(v * v)) * scale_factor


if __name__ == "__main__":
    key = jax.random.PRNGKey(0)
    kp, kx1, kx2 = jax.random.split(key, 3)

    params = init_params(kp)

    # Batch large enough to exercise the tiled grid (two 128-lane tiles).
    x_big = jax.random.normal(kx1, (256, 6), jnp.float32)
    out_big = jax.block_until_ready(critic_forward(x_big, params))
    ref_big = reference_forward(x_big, params)
    assert out_big.shape == (256, 1)
    assert jnp.allclose(out_big, ref_big, atol=0.5, rtol=1e-3), (
        float(jnp.max(jnp.abs(out_big - ref_big))))

    # Tiny batch from the original module spec (padded to one 128-lane tile).
    x_small = jax.random.normal(kx2, (8, 6), jnp.float32)
    out_small = jax.block_until_ready(critic_forward(x_small, params))
    ref_small = reference_forward(x_small, params)
    assert out_small.shape == (8, 1)
    assert jnp.allclose(out_small, ref_small, atol=0.5, rtol=1e-3), (
        float(jnp.max(jnp.abs(out_small - ref_small))))

    print("KERNEL_OK")
</pallas_src>

<mosaic_0001>
module attributes {stable_mosaic.version = 11 : i64} {
  func.func @critic_kernel(%arg0: i32, %arg1: memref<8x128xf32, #tpu.memory_space<vmem>>, %arg2: memref<128x8xbf16, #tpu.memory_space<vmem>>, %arg3: memref<128x1xf32, #tpu.memory_space<vmem>>, %arg4: memref<128x128xbf16, #tpu.memory_space<vmem>>, %arg5: memref<128x1xf32, #tpu.memory_space<vmem>>, %arg6: memref<128x1xf32, #tpu.memory_space<vmem>>, %arg7: memref<1xf32, #tpu.memory_space<smem>>, %arg8: memref<1x128xf32, #tpu.memory_space<vmem>>) attributes {dimension_semantics = [#tpu.dimension_semantics<parallel>], iteration_bounds = array<i64: 2>, scalar_prefetch = 0 : i64, scratch_operands = 0 : i64, tpu.core_type = #tpu.core_type<tc>, window_params = [{transform_indices = @transform_0, window_bounds = array<i64: 8, 128>}, {pipeline_mode = #tpu.pipeline_mode<synchronous>, transform_indices = @transform_1, window_bounds = array<i64: 128, 8>}, {pipeline_mode = #tpu.pipeline_mode<synchronous>, transform_indices = @transform_2, window_bounds = array<i64: 128, 1>}, {pipeline_mode = #tpu.pipeline_mode<synchronous>, transform_indices = @transform_3, window_bounds = array<i64: 128, 128>}, {pipeline_mode = #tpu.pipeline_mode<synchronous>, transform_indices = @transform_4, window_bounds = array<i64: 128, 1>}, {pipeline_mode = #tpu.pipeline_mode<synchronous>, transform_indices = @transform_5, window_bounds = array<i64: 128, 1>}, {transform_indices = @transform_6, window_bounds = array<i64: 1>}, {transform_indices = @transform_7, window_bounds = array<i64: 1, 128>}]} {
    %c0 = arith.constant 0 : index
    %c0_0 = arith.constant 0 : index
    %0 = vector.load %arg1[%c0, %c0_0] : memref<8x128xf32, #tpu.memory_space<vmem>>, vector<8x128xf32>
    %1 = arith.truncf %0 : vector<8x128xf32> to vector<8x128xbf16>
    %c0_1 = arith.constant 0 : index
    %c0_2 = arith.constant 0 : index
    %2 = vector.load %arg2[%c0_1, %c0_2] : memref<128x8xbf16, #tpu.memory_space<vmem>>, vector<128x8xbf16>
    %cst = arith.constant dense<0.000000e+00> : vector<128x128xf32>
    %3 = tpu.matmul %2, %1, %cst {dimension_numbers = #tpu.dot_dimension_numbers<[1], [0], [0], [1], [0, 0, 1, 1], [], []>} : vector<128x8xbf16>, vector<8x128xbf16>, vector<128x128xf32> -> vector<128x128xf32>
    %c0_3 = arith.constant 0 : index
    %c0_4 = arith.constant 0 : index
    %4 = vector.load %arg3[%c0_3, %c0_4] : memref<128x1xf32, #tpu.memory_space<vmem>>, vector<128x1xf32>
    %5 = vector.broadcast %4 : vector<128x1xf32> to vector<128x128xf32>
    %6 = arith.addf %3, %5 : vector<128x128xf32>
    %cst_5 = arith.constant 0.000000e+00 : f32
    %7 = vector.broadcast %cst_5 : f32 to vector<128x128xf32>
    %8 = arith.cmpf ogt, %6, %7 : vector<128x128xf32>
    %cst_6 = arith.constant 0.00999999977 : f32
    %9 = vector.broadcast %cst_6 : f32 to vector<128x128xf32>
    %10 = arith.mulf %9, %6 : vector<128x128xf32>
    %11 = arith.select %8, %6, %10 : vector<128x128xi1>, vector<128x128xf32>
    %c0_7 = arith.constant 0 : index
    %c0_8 = arith.constant 0 : index
    %12 = vector.load %arg4[%c0_7, %c0_8] : memref<128x128xbf16, #tpu.memory_space<vmem>>, vector<128x128xbf16>
    %13 = arith.truncf %11 : vector<128x128xf32> to vector<128x128xbf16>
    %cst_9 = arith.constant dense<0.000000e+00> : vector<128x128xf32>
    %14 = tpu.matmul %12, %13, %cst_9 {dimension_numbers = #tpu.dot_dimension_numbers<[1], [0], [0], [1], [0, 0, 1, 1], [], []>} : vector<128x128xbf16>, vector<128x128xbf16>, vector<128x128xf32> -> vector<128x128xf32>
    %c0_10 = arith.constant 0 : index
    %c0_11 = arith.constant 0 : index
    %15 = vector.load %arg5[%c0_10, %c0_11] : memref<128x1xf32, #tpu.memory_space<vmem>>, vector<128x1xf32>
    %16 = vector.broadcast %15 : vector<128x1xf32> to vector<128x128xf32>
    %17 = arith.addf %14, %16 : vector<128x128xf32>
    %cst_12 = arith.constant 0.000000e+00 : f32
    %18 = vector.broadcast %cst_12 : f32 to vector<128x128xf32>
    %19 = arith.cmpf ogt, %17, %18 : vector<128x128xf32>
    %cst_13 = arith.constant 0.00999999977 : f32
    %20 = vector.broadcast %cst_13 : f32 to vector<128x128xf32>
    %21 = arith.mulf %20, %17 : vector<128x128xf32>
    %22 = arith.select %19, %17, %21 : vector<128x128xi1>, vector<128x128xf32>
    %c0_14 = arith.constant 0 : index
    %c0_15 = arith.constant 0 : index
    %23 = vector.load %arg6[%c0_14, %c0_15] : memref<128x1xf32, #tpu.memory_space<vmem>>, vector<128x1xf32>
    %24 = vector.broadcast %23 : vector<128x1xf32> to vector<128x128xf32>
    %25 = arith.mulf %22, %24 : vector<128x128xf32>
    %cst_16 = arith.constant dense<0.000000e+00> : vector<128xf32>
    %26 = vector.multi_reduction <add>, %25, %cst_16 [0] : vector<128x128xf32> to vector<128xf32>
    %27 = vector.shape_cast %26 : vector<128xf32> to vector<1x128xf32>
    %c0_17 = arith.constant 0 : index
    %28 = memref.load %arg7[%c0_17] : memref<1xf32, #tpu.memory_space<smem>>
    %29 = vector.broadcast %28 : f32 to vector<1x128xf32>
    %30 = arith.addf %27, %29 : vector<1x128xf32>
    %31 = arith.mulf %30, %30 : vector<1x128xf32>
    %cst_18 = arith.constant 0.000000e+00 : f32
    %32 = vector.broadcast %cst_18 : f32 to vector<1x128xf32>
    %33 = arith.subf %32, %31 : vector<1x128xf32>
    %34 = math.tanh %33 : vector<1x128xf32>
    %cst_19 = arith.constant -5.000000e+03 : f32
    %35 = vector.broadcast %cst_19 : f32 to vector<1x128xf32>
    %36 = arith.mulf %34, %35 : vector<1x128xf32>
    %c0_20 = arith.constant 0 : index
    %c0_21 = arith.constant 0 : index
    %37 = vector.load %arg8[%c0_20, %c0_21] : memref<1x128xf32, #tpu.memory_space<vmem>>, vector<1x128xf32>
    tpu.vector_store %arg8[%c0_20, %c0_21], %36 {strides = array<i32>} : memref<1x128xf32, #tpu.memory_space<vmem>>, vector<1x128xf32>,
    return
  }
  func.func @transform_0(%arg0: i32) -> (i32, i32) {
    %c0_i32 = arith.constant 0 : i32
    %c0_i32_0 = arith.constant 0 : i32
    return %c0_i32, %arg0 : i32, i32
  }
  func.func @transform_1(%arg0: i32) -> (i32, i32) {
    %c0_i32 = arith.constant 0 : i32
    %c0_i32_0 = arith.constant 0 : i32
    %c0_i32_1 = arith.constant 0 : i32
    return %c0_i32, %c0_i32_0 : i32, i32
  }
  func.func @transform_2(%arg0: i32) -> (i32, i32) {
    %c0_i32 = arith.constant 0 : i32
    %c0_i32_0 = arith.constant 0 : i32
    %c0_i32_1 = arith.constant 0 : i32
    return %c0_i32, %c0_i32_0 : i32, i32
  }
  func.func @transform_3(%arg0: i32) -> (i32, i32) {
    %c0_i32 = arith.constant 0 : i32
    %c0_i32_0 = arith.constant 0 : i32
    %c0_i32_1 = arith.constant 0 : i32
    return %c0_i32, %c0_i32_0 : i32, i32
  }
  func.func @transform_4(%arg0: i32) -> (i32, i32) {
    %c0_i32 = arith.constant 0 : i32
    %c0_i32_0 = arith.constant 0 : i32
    %c0_i32_1 = arith.constant 0 : i32
    return %c0_i32, %c0_i32_0 : i32, i32
  }
  func.func @transform_5(%arg0: i32) -> (i32, i32) {
    %c0_i32 = arith.constant 0 : i32
    %c0_i32_0 = arith.constant 0 : i32
    %c0_i32_1 = arith.constant 0 : i32
    return %c0_i32, %c0_i32_0 : i32, i32
  }
  func.func @transform_6(%arg0: i32) -> i32 {
    %c0_i32 = arith.constant 0 : i32
    %c0_i32_0 = arith.constant 0 : i32
    return %c0_i32 : i32
  }
  func.func @transform_7(%arg0: i32) -> (i32, i32) {
    %c0_i32 = arith.constant 0 : i32
    %c0_i32_0 = arith.constant 0 : i32
    return %c0_i32, %arg0 : i32, i32
  }
}

</mosaic_0001>

<bundles_post_ra>
// kernel: tpu_custom_call.1
= control target key start
LH: loop header
LB: loop body
LE: loop exit
PB: predicated region body
PF: predicated region fallthrough
CT: control target
= control target key end

     0   :  { %s1626_s0 = inlined_call_operand.vmem [shape: f32[8,256], index: 0, kind: input, shape index: {}]   ;;  %s1627_s1 = inlined_call_operand.vmem [shape: bf16[128,8], index: 1, kind: input, shape index: {}]   ;;  %s1628_s2 = inlined_call_operand.vmem [shape: f32[128,1], index: 2, kind: input, shape index: {}]   ;;  %s1629_s3 = inlined_call_operand.vmem [shape: bf16[128,128], index: 3, kind: input, shape index: {}]   ;;  %s1630_s4 = inlined_call_operand.vmem [shape: f32[128,1], index: 4, kind: input, shape index: {}]   ;;  %s1631_s5 = inlined_call_operand.vmem [shape: f32[128,1], index: 5, kind: input, shape index: {}]   ;;  %s1632_s6 = inlined_call_operand.<no memory space> [shape: f32[1], index: 6, kind: input, shape index: {}]   ;;  %s1633_s7 = inlined_call_operand.hbm [shape: f32[1,256], index: 7, kind: output, shape index: {}]  }
   0x1   :  { %12 = sst [smem:[#allocation2]] %s1632_s6 }
   0x2   :  { %13 = vsyncpa [#allocation4], 0 }
   0x3   :  { %15 = vsyncpa [#allocation4 + $0x1], 0  ;;  %s1286_s26 = smov 0   ;;  %s1288_s27 = smov 0  }
   0x4   :  { %s1290_s28 = smov 0   ;;  %s1292_s29 = smov 0  }
   0x5 LB: > { %s1307_s6 = sadd.s32 4294967295, %s1240_s29   ;;  %s1029_s30 = sadd.s32 4294967294, %s1240_s29   ;;  %s1240_s29 = sphi %s1292_s29, %s1639_s29   ;;  %s1236_s28 = sphi %s1290_s28, %s1638_s28   ;;  %s1232_s27 = sphi %s1288_s27, %s1637_s27   ;;  %s1228_s26 = sphi %s1286_s26, %s1636_s26  }
   0x6   : > { %s1311_s8 = sadd.s32 1, %s1240_s29   ;;  %s180_s9 = sadd.s32 1, %s1236_s28 }
   0x7   : > { %s177_s10 = ssub.s32 %s1240_s29, %s1311_s8  ;;  %p190_p0 = scmp.ne.s32.totalorder %s1236_s28, %s1232_s27 }
   0x8   : > { %p178_p1 = scmp.eq.s32.totalorder %s177_s10, 0  ;;  %p191_p2 = scmp.eq.s32.totalorder %s1307_s6, 1 }
   0x9   : > { %p196_p3 = scmp.ne.s32.totalorder %s1232_s27, %s1228_s26  ;;  %p197_p4 = scmp.eq.s32.totalorder %s1029_s30, 1 }
   0xa   : > { %s1322_s11 = scalar_select %p178_p1, %s1236_s28, %s180_s9  }
   0xb   : > { %p1324_p5 = por %p191_p2, %p190_p0  ;;  %p1328_p6 = por %p197_p4, %p196_p3 }
   0xc   : > { %p1032_p7 = scmp.ge.s32.totalorder %s1240_s29, 1  ;;  %p240_p8 = scmp.lt.s32.totalorder %s1240_s29, 3 }
   0xe   : > { %p241_p9 = pnand %p1032_p7, %p240_p8 }
   0xf   : > { %p270_p10 = scmp.lt.s32.totalorder (!%p241_p9), %s1307_s6, 1  ;;  %s953_s9 = sld [smem:[#allocation2]] (!%p241_p9) }
  0x10   : > { %244 = sbr.rel (%p241_p9) target bundleno = 494 (0x1ee), region = 48  ;;  %s268_s10 = sand.u32 (!%p241_p9), 1, %s1232_s27  }
  0x11   : > { %s970_s16 = scalar_lea.hbm (!%p241_p9), %s1633_s7, %s1307_s6  ;;  %s269_s17 = scalar_lea.vmem (!%p241_p9), [#allocation3], %s268_s10 }
  0x12   : > { %s972_s18 = sshll.u32 (!%p241_p9), %s269_s17, 4  ;;  %s974_s19 = sshll.u32 (!%p241_p9), %s970_s16, 4  ;;  %s973_s18 = int_to_ptr.vmem [resolvable:$true] %s972_s18  ;;  %s975_s19 = int_to_ptr.hbm [resolvable:$true] %s974_s19 }
  0x15   : > { %v307_v0 = vld [vmem:[%s1628_s2 + $0x70] sm:$0xff]  ;;  %v305_v1 = vld [vmem:[%s1628_s2 + $0x60] sm:$0xff]  ;;  %v1242_v3 = vmov 0   ;;  %s271_s20 = scalar_select %p270_p10, %s1307_s6, 1  ;;  %vm454_vm0 = vcmask 1043456   ;;  %v306_v5 = vld [vmem:[%s1628_s2 + $0x68] sm:$0xff] }
  0x16   : > { %v303_v2 = vld [vmem:[%s1628_s2 + $0x50] sm:$0xff]  ;;  %1175 = vset.pattern.permute.xlu2 %v1242_v3  ;;  %1174 = vset.pattern.permute.xlu1 %v1242_v3  ;;  %v308_v7 = vld [vmem:[%s1628_s2 + $0x78] sm:$0xff]  ;;  %v1108_v10 = vld [vmem:[%s1627_s1] sm:$0xff]  ;;  %vm429_vm1 = vcmask 64512   ;;  %s1198_s6 = scalar_lea.hbm %s1633_s7, 2 }
  0x17   : > { %1173 = vset.pattern.permute.xlu0 %v1242_v3  ;;  %371 = vperm.xlu1 %1174, %v305_v1   ;;  %s1033_s21 = sshll.u32 %s271_s20, 3  ;;  %v304_v8 = vld [vmem:[%s1628_s2 + $0x58] sm:$0xff]  ;;  %v1113_v11 = vld [vmem:[%s1627_s1 + $0x28] sm:$0xff]  ;;  %v301_v13 = vld [vmem:[%s1628_s2 + $0x40] sm:$0xff]  ;;  %s962_s20 = scalar_lea.sflag [#allocation4], %s268_s10 }
  0x18   : > { %381 = vperm.xlu0 %1173, %v307_v0   ;;  %361 = vperm.xlu2 %1175, %v303_v2   ;;  %s273_s24 = scalar_lea.vmem %s1626_s0, %s1033_s21  ;;  %v302_v12 = vld [vmem:[%s1628_s2 + $0x48] sm:$0xff]  ;;  %v299_v14 = vld [vmem:[%s1628_s2 + $0x30] sm:$0xff]  ;;  %v297_v15 = vld [vmem:[%s1628_s2 + $0x20] sm:$0xff]  ;;  %s1192_s21 = sshra.s32 %s975_s19, 4  ;;  %s1193_s21 = int_to_ptr.hbm [resolvable:$true] %s1192_s21 }
  0x19   : > { %v275_v4 = vld [vmem:[%s273_s24] sm:$0xff]  ;;  %v300_v16 = vld [vmem:[%s1628_s2 + $0x38] sm:$0xff]  ;;  %v298_v17 = vld [vmem:[%s1628_s2 + $0x28] sm:$0xff]  ;;  %s1194_s22 = scalar_lea.hbm %s1193_s21, 1  ;;  %p1199_p0 = scmp.lt.s32.totalorder %s1193_s21, %s1633_s7 }
  0x1a   : > { %v276_v6 = vpack.c.bf16 %v275_v4, %v275_v4  ;;  %v1109_v18 = vld [vmem:[%s1627_s1 + $0x8] sm:$0xff]  ;;  %v1114_v19 = vld [vmem:[%s1627_s1 + $0x30] sm:$0xff]  ;;  %v296_v20 = vld [vmem:[%s1628_s2 + $0x18] sm:$0xff]  ;;  %p1195_p11 = scmp.ne.s32.totalorder %s1193_s21, %s1194_s22  ;;  %p1200_p1 = scmp.lt.s32.totalorder %s1198_s6, %s1194_s22 }
  0x1b   : > { %v295_v21 = vld [vmem:[%s1628_s2 + $0x10] sm:$0xff]  ;;  %v293_v22 = vld [vmem:[%s1628_s2] sm:$0xff]  ;;  %v294_v24 = vld [vmem:[%s1628_s2 + $0x8] sm:$0xff] }
  0x1c   : > { %v456_v9 = vsel %vm454_vm0, %v276_v6, 0  ;;  %v579_v23 = vld [vmem:[%s1630_s4] sm:$0xff]  ;;  %v580_v25 = vld [vmem:[%s1630_s4 + $0x8] sm:$0xff]  ;;  %v1110_v26 = vld [vmem:[%s1627_s1 + $0x10] sm:$0xff]  ;;  %p1196_p12 = pnand %p1195_p11, %p1324_p5  ;;  %p1201_p2 = por %p1200_p1, %p1199_p0 }
  0x1d   : > { %465 = vmatpush.bf16.msra.mxu0 %v456_v9  ;;  %1124 = vmatpush.bf16.msra.mxu3 %v456_v9  ;;  %v1115_v27 = vld [vmem:[%s1627_s1 + $0x38] sm:$0xff]  ;;  %v581_v29 = vld [vmem:[%s1630_s4 + $0x10] sm:$0xff]  ;;  %v583_v30 = vld [vmem:[%s1630_s4 + $0x20] sm:$0xff] }
  0x1e   : > { %v582_v28 = vld [vmem:[%s1630_s4 + $0x18] sm:$0xff]  ;;  %v585_v31 = vld [vmem:[%s1630_s4 + $0x30] sm:$0xff]  ;;  %v584_v32 = vld [vmem:[%s1630_s4 + $0x28] sm:$0xff]  ;;  %p1197_p13 = pneg %p1196_p12 }
  0x1f   : > { %376 = vperm.xlu1 %1174, %v306_v5   ;;  %v586_v33 = vld [vmem:[%s1630_s4 + $0x38] sm:$0xff]  ;;  %v588_v35 = vld [vmem:[%s1630_s4 + $0x48] sm:$0xff]  ;;  %v587_v36 = vld [vmem:[%s1630_s4 + $0x40] sm:$0xff] }
  0x20   : > { %386 = vperm.xlu0 %1173, %v308_v7   ;;  %366 = vperm.xlu2 %1175, %v304_v8   ;;  %v1111_v34 = vld [vmem:[%s1627_s1 + $0x18] sm:$0xff]  ;;  %v589_v37 = vld [vmem:[%s1630_s4 + $0x50] sm:$0xff]  ;;  %v591_v38 = vld [vmem:[%s1630_s4 + $0x60] sm:$0xff]  ;;  %p1202_p3 = pnand %p1201_p2, %p1197_p13 }
  0x21   : > { %1066 = vmatmul.msk.bf16.vlgmr.msra.gmra.mxu0 %vm429_vm1, %v1108_v10  ;;  %1071 = vmatmul.msk.bf16.vlgmr.msra.gmra.mxu3 %vm429_vm1, %v1113_v11  ;;  %v590_v39 = vld [vmem:[%s1630_s4 + $0x58] sm:$0xff]  ;;  %v592_v40 = vld [vmem:[%s1630_s4 + $0x68] sm:$0xff]  ;;  %v1112_v41 = vld [vmem:[%s1627_s1 + $0x20] sm:$0xff] }
  0x22   : > { %v594_v42 = vld [vmem:[%s1630_s4 + $0x78] sm:$0xff]  ;;  %v593_v43 = vld [vmem:[%s1630_s4 + $0x70] sm:$0xff]  ;;  %v820_v44 = vld [vmem:[%s1631_s5] sm:$0xff] }
  0x23   : > { %v822_v45 = vld [vmem:[%s1631_s5 + $0x10] sm:$0xff]  ;;  %v821_v46 = vld [vmem:[%s1631_s5 + $0x8] sm:$0xff]  ;;  %v823_v47 = vld [vmem:[%s1631_s5 + $0x18] sm:$0xff] }
  0x24   : > { %v825_v48 = vld [vmem:[%s1631_s5 + $0x28] sm:$0xff]  ;;  %v824_v49 = vld [vmem:[%s1631_s5 + $0x20] sm:$0xff]  ;;  %v826_v50 = vld [vmem:[%s1631_s5 + $0x30] sm:$0xff] }
  0x25   : > { %v828_v51 = vld [vmem:[%s1631_s5 + $0x40] sm:$0xff]  ;;  %v827_v52 = vld [vmem:[%s1631_s5 + $0x38] sm:$0xff]  ;;  %v829_v53 = vld [vmem:[%s1631_s5 + $0x48] sm:$0xff] }
  0x26   : > { %v831_v54 = vld [vmem:[%s1631_s5 + $0x58] sm:$0xff]  ;;  %v830_v55 = vld [vmem:[%s1631_s5 + $0x50] sm:$0xff]  ;;  %v832_v56 = vld [vmem:[%s1631_s5 + $0x60] sm:$0xff] }
  0x27   : > { %356 = vperm.xlu1 %1174, %v302_v12   ;;  %v834_v59 = vld [vmem:[%s1631_s5 + $0x70] sm:$0xff]  ;;  %v833_v60 = vld [vmem:[%s1631_s5 + $0x68] sm:$0xff]  ;;  %v835_v61 = vld [vmem:[%s1631_s5 + $0x78] sm:$0xff] }
  0x28   : > { %351 = vperm.xlu0 %1173, %v301_v13   ;;  %341 = vperm.xlu2 %1175, %v299_v14  }
  0x2f   : > { %331 = vperm.xlu1 %1174, %v297_v15  }
  0x30   : > { %346 = vperm.xlu0 %1173, %v300_v16   ;;  %336 = vperm.xlu2 %1175, %v298_v17  }
  0x31   : > { %1067 = vmatmul.msk.bf16.gmra.mxu0 %vm429_vm1, %v1109_v18  ;;  %1072 = vmatmul.msk.bf16.gmra.mxu3 %vm429_vm1, %v1114_v19 }
  0x37   : > { %326 = vperm.xlu1 %1174, %v296_v20  }
  0x38   : > { %321 = vperm.xlu0 %1173, %v295_v21   ;;  %311 = vperm.xlu2 %1175, %v293_v22  }
  0x3f   : > { %597 = vperm.xlu1 %1174, %v579_v23  }
  0x40   : > { %316 = vperm.xlu0 %1173, %v294_v24   ;;  %602 = vperm.xlu2 %1175, %v580_v25  }
  0x41   : > { %1068 = vmatmul.msk.bf16.gmra.mxu0 %vm429_vm1, %v1110_v26  ;;  %1073 = vmatmul.msk.bf16.gmra.mxu3 %vm429_vm1, %v1115_v27 }
  0x47   : > { %612 = vperm.xlu1 %1174, %v582_v28  }
  0x48   : > { %607 = vperm.xlu0 %1173, %v581_v29   ;;  %617 = vperm.xlu2 %1175, %v583_v30  }
  0x4f   : > { %627 = vperm.xlu1 %1174, %v585_v31  }
  0x50   : > { %622 = vperm.xlu0 %1173, %v584_v32   ;;  %632 = vperm.xlu2 %1175, %v586_v33  }
  0x51   : > { %1069 = vmatmul.msk.bf16.gmra.mxu0 %vm429_vm1, %v1111_v34 }
  0x57   : > { %642 = vperm.xlu1 %1174, %v588_v35  }
  0x58   : > { %637 = vperm.xlu0 %1173, %v587_v36   ;;  %647 = vperm.xlu2 %1175, %v589_v37  }
  0x5f   : > { %657 = vperm.xlu1 %1174, %v591_v38  }
  0x60   : > { %652 = vperm.xlu0 %1173, %v590_v39   ;;  %662 = vperm.xlu2 %1175, %v592_v40  }
  0x61   : > { %1070 = vmatmul.msk.bf16.gmra.mxu0 %vm429_vm1, %v1112_v41 }
  0x67   : > { %672 = vperm.xlu1 %1174, %v594_v42  }
  0x68   : > { %667 = vperm.xlu0 %1173, %v593_v43   ;;  %838 = vperm.xlu2 %1175, %v820_v44  }
  0x6f   : > { %848 = vperm.xlu1 %1174, %v822_v45  }
  0x70   : > { %843 = vperm.xlu0 %1173, %v821_v46   ;;  %853 = vperm.xlu2 %1175, %v823_v47  }
  0x72   : > { %v362_v57 = vpop.permute.xlu2 %361 }
  0x77   : > { %863 = vperm.xlu1 %1174, %v825_v48  }
  0x78   : > { %858 = vperm.xlu0 %1173, %v824_v49   ;;  %868 = vperm.xlu2 %1175, %v826_v50  }
  0x7a   : > { %v367_v62 = vpop.permute.xlu2 %366 }
  0x7f   : > { %878 = vperm.xlu1 %1174, %v828_v51  }
  0x80   : > { %873 = vperm.xlu0 %1173, %v827_v52   ;;  %883 = vperm.xlu2 %1175, %v829_v53  }
  0x82   : > { %v1515_v0 = vpop.permute.xlu2 %341 }
  0x87   : > { %893 = vperm.xlu1 %1174, %v831_v54  }
  0x88   : > { %888 = vperm.xlu0 %1173, %v830_v55   ;;  %898 = vperm.xlu2 %1175, %v832_v56  }
  0x89   : > { %v372_v23 = vpop.permute.xlu1 %371 }
  0x8a   : > { %v382_v58 = vpop.permute.xlu0 %381  ;;  %v1521_v4 = vpop.permute.xlu2 %336 }
  0x8f   : > { %908 = vperm.xlu1 %1174, %v834_v59  }
  0x90   : > { %903 = vperm.xlu0 %1173, %v833_v60   ;;  %913 = vperm.xlu2 %1175, %v835_v61  }
  0x91   : > { %v377_v27 = vpop.permute.xlu1 %376 }
  0x92   : > { %v387_v63 = vpop.permute.xlu0 %386  ;;  %v312_v8 = vpop.permute.xlu2 %311 }
  0x99   : > { %v357_v47 = vpop.permute.xlu1 %356 }
  0x9a   : > { %v1517_v1 = vpop.permute.xlu0 %351 }
  0x9e   : > { %v467_v2 = vpop.f32.mrf.mxu0 }
  0x9f   : > { %v468_v9 = vadd.f32 %v467_v2, %v312_v8 }
  0xa1   : > { %v523_v13 = vmul.f32 0.01, %v468_v9  ;;  %vm507_vm2 = vcmp.gt.f32.partialorder %v468_v9, 0.0  ;;  %v332_v53 = vpop.permute.xlu1 %331 }
  0xa2   : > { %v1519_v3 = vpop.permute.xlu0 %346 }
  0xa3   : > { %v539_v18 = vsel %vm507_vm2, %v468_v9, %v523_v13 }
  0xa4   : > { %v492_v5 = vpop.f32.mrf.mxu3 }
  0xa5   : > { %v493_v34 = vadd.f32 %v492_v5, %v362_v57 }
  0xa6   : > { %v469_v6 = vpop.f32.mrf.mxu0 }
  0xa7   : > { %v533_v42 = vmul.f32 0.01, %v493_v34  ;;  %vm517_vm8 = vcmp.gt.f32.partialorder %v493_v34, 0.0 }
  0xa9   : > { %v549_v49 = vsel %vm517_vm8, %v493_v34, %v533_v42  ;;  %v327_v8 = vpop.permute.xlu1 %326 }
  0xaa   : > { %v1523_v7 = vpop.permute.xlu0 %321 }
  0xac   : > { %v494_v10 = vpop.f32.mrf.mxu3 }
  0xad   : > { %v495_v35 = vadd.f32 %v494_v10, %v367_v62 }
  0xae   : > { %v1525_v11 = vpop.f32.mrf.mxu0 }
  0xaf   : > { %v534_v43 = vmul.f32 0.01, %v495_v35  ;;  %vm518_vm9 = vcmp.gt.f32.partialorder %v495_v35, 0.0 }
  0xb1   : > { %v550_v50 = vsel %vm518_vm9, %v495_v35, %v534_v43 }
  0xb2   : > { %v317_v12 = vpop.permute.xlu0 %316  ;;  %v576_v51 = vpack.c.bf16 %v550_v50, %v549_v49 }
  0xb3   : > { %v470_v14 = vadd.f32 %v469_v6, %v317_v12 }
  0xb4   : > { %v497_v16 = vpop.f32.mrf.mxu3 }
  0xb5   : > { %v524_v15 = vmul.f32 0.01, %v470_v14  ;;  %vm508_vm3 = vcmp.gt.f32.partialorder %v470_v14, 0.0  ;;  %v498_v28 = vadd.f32 %v497_v16, %v372_v23  ;;  %v1117_v23 = vld [vmem:[%s1629_s3 + $0x8] sm:$0xff] }
  0xb6   : > { %v1527_v17 = vpop.f32.mrf.mxu0 }
  0xb7   : > { %v540_v19 = vsel %vm508_vm3, %v470_v14, %v524_v15  ;;  %v535_v36 = vmul.f32 0.01, %v498_v28  ;;  %vm519_vm6 = vcmp.gt.f32.partialorder %v498_v28, 0.0 }
  0xb8   : > { %v1529_v20 = vpack.c.bf16 %v540_v19, %v539_v18 }
  0xb9   : > { %v551_v44 = vsel %vm519_vm6, %v498_v28, %v535_v36  ;;  %v598_v28 = vpop.permute.xlu1 %597 }
  0xbc   : > { %v499_v21 = vpop.f32.mrf.mxu3 }
  0xbd   : > { %v500_v29 = vadd.f32 %v499_v21, %v377_v27  ;;  %v1123_v27 = vld [vmem:[%s1629_s3 + $0x38] sm:$0xff] }
  0xbe   : > { %v477_v22 = vpop.f32.mrf.mxu0 }
  0xbf   : > { %v536_v37 = vmul.f32 0.01, %v500_v29  ;;  %vm520_vm7 = vcmp.gt.f32.partialorder %v500_v29, 0.0 }
  0xc1   : > { %v552_v45 = vsel %vm520_vm7, %v500_v29, %v536_v37  ;;  %v603_v29 = vpop.permute.xlu2 %602 }
  0xc2   : > { %v577_v48 = vpack.c.bf16 %v552_v45, %v551_v44 }
  0xc4   : > { %v502_v24 = vpop.f32.mrf.mxu3 }
  0xc5   : > { %v503_v26 = vadd.f32 %v502_v24, %v382_v58  ;;  %v1121_v24 = vld [vmem:[%s1629_s3 + $0x28] sm:$0xff] }
  0xc6   : > { %v479_v25 = vpop.f32.mrf.mxu0 }
  0xc7   : > { %v537_v30 = vmul.f32 0.01, %v503_v26  ;;  %vm521_vm4 = vcmp.gt.f32.partialorder %v503_v26, 0.0  ;;  %v480_v60 = vadd.f32 %v479_v25, %v1521_v4  ;;  %v473_v4 = vadd.f32 %v1525_v11, %v1523_v7  ;;  %v1116_v7 = vld [vmem:[%s1629_s3] sm:$0xff]  ;;  %v1118_v25 = vld [vmem:[%s1629_s3 + $0x10] sm:$0xff] }
  0xc8   : > { %v1120_v11 = vld [vmem:[%s1629_s3 + $0x20] sm:$0xff] }
  0xc9   : > { %v553_v39 = vsel %vm521_vm4, %v503_v26, %v537_v30  ;;  %v528_v9 = vmul.f32 0.01, %v480_v60  ;;  %vm512_vm14 = vcmp.gt.f32.partialorder %v480_v60, 0.0  ;;  %v525_v16 = vmul.f32 0.01, %v473_v4  ;;  %v1119_v26 = vld [vmem:[%s1629_s3 + $0x18] sm:$0xff]  ;;  %v608_v30 = vpop.permute.xlu0 %607 }
  0xca   : > { %vm509_vm1 = vcmp.gt.f32.partialorder %v473_v4, 0.0 }
  0xcb   : > { %v544_v15 = vsel %vm512_vm14, %v480_v60, %v528_v9  ;;  %v541_v21 = vsel %vm509_vm1, %v473_v4, %v525_v16 }
  0xcc   : > { %v504_v31 = vpop.f32.mrf.mxu3 }
  0xcd   : > { %v505_v33 = vadd.f32 %v504_v31, %v387_v63  ;;  %v478_v63 = vadd.f32 %v477_v22, %v332_v53  ;;  %v613_v31 = vpop.permute.xlu1 %612 }
  0xce   : > { %v482_v32 = vpop.f32.mrf.mxu0 }
  0xcf   : > { %v538_v38 = vmul.f32 0.01, %v505_v33  ;;  %vm522_vm5 = vcmp.gt.f32.partialorder %v505_v33, 0.0  ;;  %v483_v57 = vadd.f32 %v482_v32, %v1515_v0  ;;  %v527_v10 = vmul.f32 0.01, %v478_v63  ;;  %v618_v32 = vpop.permute.xlu2 %617 }
  0xd0   : > { %vm511_vm15 = vcmp.gt.f32.partialorder %v478_v63, 0.0 }
  0xd1   : > { %v554_v40 = vsel %vm522_vm5, %v505_v33, %v538_v38  ;;  %v529_v2 = vmul.f32 0.01, %v483_v57  ;;  %vm513_vm13 = vcmp.gt.f32.partialorder %v483_v57, 0.0  ;;  %v543_v18 = vsel %vm511_vm15, %v478_v63, %v527_v10  ;;  %v623_v33 = vpop.permute.xlu0 %622 }
  0xd2   : > { %v578_v41 = vpack.c.bf16 %v554_v40, %v553_v39 }
  0xd3   : > { %v545_v12 = vsel %vm513_vm13, %v483_v57, %v529_v2 }
  0xd4   : > { %723 = vmatpush.bf16.msra.mxu1 %v578_v41  ;;  %1125 = vmatpush.bf16.msra.mxu2 %v578_v41 }
  0xd5   : > { %v628_v34 = vpop.permute.xlu1 %627 }
  0xd6   : > { %v484_v46 = vpop.f32.mrf.mxu0 }
  0xd7   : > { %v485_v55 = vadd.f32 %v484_v46, %v1519_v3  ;;  %v475_v3 = vadd.f32 %v1527_v17, %v327_v8  ;;  %v573_v17 = vpack.c.bf16 %v544_v15, %v543_v18  ;;  %v1564_v35 = vpop.permute.xlu2 %632 }
  0xd8   : > { %724 = vmatpush.bf16.msra.mxu1 %v577_v48  ;;  %1126 = vmatpush.bf16.msra.mxu2 %v577_v48 }
  0xd9   : > { %v530_v61 = vmul.f32 0.01, %v485_v55  ;;  %vm514_vm12 = vcmp.gt.f32.partialorder %v485_v55, 0.0  ;;  %v526_v14 = vmul.f32 0.01, %v475_v3  ;;  %vm510_vm0 = vcmp.gt.f32.partialorder %v475_v3, 0.0  ;;  %v638_v37 = vpop.permute.xlu0 %637 }
  0xdb   : > { %v546_v0 = vsel %vm514_vm12, %v485_v55, %v530_v61  ;;  %v542_v19 = vsel %vm510_vm0, %v475_v3, %v526_v14 }
  0xdc   : > { %725 = vmatpush.bf16.msra.mxu1 %v576_v51  ;;  %1127 = vmatpush.bf16.msra.mxu2 %v576_v51  ;;  %v574_v13 = vpack.c.bf16 %v546_v0, %v545_v12  ;;  %v572_v22 = vpack.c.bf16 %v542_v19, %v541_v21 }
  0xdd   : > { %v1566_v38 = vpop.permute.xlu1 %642 }
  0xde   : > { %v487_v52 = vpop.f32.mrf.mxu0 }
  0xdf   : > { %v488_v54 = vadd.f32 %v487_v52, %v1517_v1  ;;  %v1568_v40 = vpop.permute.xlu2 %647 }
  0xe1   : > { %v531_v58 = vmul.f32 0.01, %v488_v54  ;;  %vm515_vm10 = vcmp.gt.f32.partialorder %v488_v54, 0.0  ;;  %v1570_v42 = vpop.permute.xlu0 %652 }
  0xe3   : > { %v547_v5 = vsel %vm515_vm10, %v488_v54, %v531_v58 }
  0xe5   : > { %v1572_v44 = vpop.permute.xlu1 %657 }
  0xe6   : > { %v489_v56 = vpop.f32.mrf.mxu0 }
  0xe7   : > { %v490_v59 = vadd.f32 %v489_v56, %v357_v47  ;;  %v1574_v46 = vpop.permute.xlu2 %662 }
  0xe9   : > { %v532_v62 = vmul.f32 0.01, %v490_v59  ;;  %vm516_vm11 = vcmp.gt.f32.partialorder %v490_v59, 0.0  ;;  %v1576_v48 = vpop.permute.xlu0 %667 }
  0xeb   : > { %v548_v6 = vsel %vm516_vm11, %v490_v59, %v532_v62 }
  0xec   : > { %v575_v1 = vpack.c.bf16 %v548_v6, %v547_v5 }
  0xed   : > { %v1578_v50 = vpop.permute.xlu1 %672 }
  0xee   : > { %726 = vmatpush.bf16.msra.mxu1 %v575_v1  ;;  %1128 = vmatpush.bf16.msra.mxu2 %v575_v1 }
  0xef   : > { %v839_v51 = vpop.permute.xlu2 %838 }
  0xf1   : > { %v844_v54 = vpop.permute.xlu0 %843 }
  0xf2   : > { %727 = vmatpush.bf16.msra.mxu1 %v574_v13  ;;  %1129 = vmatpush.bf16.msra.mxu2 %v574_v13 }
  0xf5   : > { %v849_v55 = vpop.permute.xlu1 %848 }
  0xf6   : > { %728 = vmatpush.bf16.msra.mxu1 %v573_v17  ;;  %1130 = vmatpush.bf16.msra.mxu2 %v573_v17 }
  0xf7   : > { %v854_v56 = vpop.permute.xlu2 %853 }
  0xf9   : > { %v859_v2 = vpop.permute.xlu0 %858 }
  0xfa   : > { %729 = vmatpush.bf16.msra.mxu1 %v572_v22  ;;  %1131 = vmatpush.bf16.msra.mxu2 %v572_v22 }
  0xfd   : > { %v864_v1 = vpop.permute.xlu1 %863 }
  0xfe   : > { %730 = vmatpush.bf16.msra.mxu1 %v1529_v20  ;;  %1132 = vmatpush.bf16.msra.mxu2 %v1529_v20  ;;  %v1122_v20 = vld [vmem:[%s1629_s3 + $0x30] sm:$0xff] }
  0xff   : > { %v869_v10 = vpop.permute.xlu2 %868 }
 0x101   : > { %731 = vmatmul.bf16.vlgmr.msra.gmra.mxu1 %v1116_v7  ;;  %751 = vmatmul.bf16.vlgmr.msra.gmra.mxu2 %v1120_v11 }
 0x111   : > { %736 = vmatmul.bf16.gmra.mxu1 %v1117_v23  ;;  %756 = vmatmul.bf16.gmra.mxu2 %v1121_v24 }
 0x121   : > { %741 = vmatmul.bf16.gmra.mxu1 %v1118_v25  ;;  %761 = vmatmul.bf16.gmra.mxu2 %v1122_v20  ;;  %v874_v25 = vpop.permute.xlu0 %873 }
 0x131   : > { %746 = vmatmul.bf16.gmra.mxu1 %v1119_v26  ;;  %766 = vmatmul.bf16.gmra.mxu2 %v1123_v27 }
 0x17e   : > { %v732_v36 = vpop.f32.mrf.mxu1 }
 0x17f   : > { %v733_v59 = vadd.f32 %v732_v36, %v598_v28 }
 0x181   : > { %v788_v5 = vmul.f32 0.01, %v733_v59  ;;  %vm772_vm3 = vcmp.gt.f32.partialorder %v733_v59, 0.0 }
 0x183   : > { %v804_v12 = vsel %vm772_vm3, %v733_v59, %v788_v5 }
 0x184   : > { %v752_v39 = vpop.f32.mrf.mxu2  ;;  %v916_v21 = vmul.f32 %v839_v51, %v804_v12 }
 0x185   : > { %v753_v20 = vadd.f32 %v752_v39, %v638_v37 }
 0x186   : > { %v734_v41 = vpop.f32.mrf.mxu1 }
 0x187   : > { %v735_v57 = vadd.f32 %v734_v41, %v603_v29  ;;  %v884_v41 = vpop.permute.xlu2 %883  ;;  %vm780_vm9 = vcmp.gt.f32.partialorder %v753_v20, 0.0 }
 0x189   : > { %v789_v62 = vmul.f32 0.01, %v735_v57  ;;  %vm773_vm2 = vcmp.gt.f32.partialorder %v735_v57, 0.0 }
 0x18b   : > { %v805_v3 = vsel %vm773_vm2, %v735_v57, %v789_v62 }
 0x18c   : > { %v754_v43 = vpop.f32.mrf.mxu2  ;;  %v917_v15 = vmul.f32 %v844_v54, %v805_v3 }
 0x18e   : > { %v737_v45 = vpop.f32.mrf.mxu1  ;;  %v932_v23 = vadd.f32 %v917_v15, %v916_v21 }
 0x18f   : > { %v738_v60 = vadd.f32 %v737_v45, %v608_v30  ;;  %v879_v30 = vpop.permute.xlu1 %878  ;;  %v796_v45 = vmul.f32 0.01, %v753_v20 }
 0x191   : > { %v790_v6 = vmul.f32 0.01, %v738_v60  ;;  %vm774_vm4 = vcmp.gt.f32.partialorder %v738_v60, 0.0 }
 0x193   : > { %v806_v13 = vsel %vm774_vm4, %v738_v60, %v790_v6 }
 0x194   : > { %v757_v47 = vpop.f32.mrf.mxu2  ;;  %v918_v22 = vmul.f32 %v849_v55, %v806_v13 }
 0x196   : > { %v739_v49 = vpop.f32.mrf.mxu1  ;;  %v933_v27 = vadd.f32 %v932_v23, %v918_v22 }
 0x197   : > { %v740_v63 = vadd.f32 %v739_v49, %v613_v31  ;;  %v755_v31 = vadd.f32 %v754_v43, %v1566_v38  ;;  %v758_v49 = vadd.f32 %v757_v47, %v1568_v40  ;;  %v812_v43 = vsel %vm780_vm9, %v753_v20, %v796_v45  ;;  %v889_v47 = vpop.permute.xlu0 %888 }
 0x199   : > { %v791_v9 = vmul.f32 0.01, %v740_v63  ;;  %vm775_vm5 = vcmp.gt.f32.partialorder %v740_v63, 0.0  ;;  %v797_v39 = vmul.f32 0.01, %v755_v31  ;;  %vm781_vm11 = vcmp.gt.f32.partialorder %v755_v31, 0.0 }
 0x19a   : > { %vm782_vm12 = vcmp.gt.f32.partialorder %v758_v49, 0.0 }
 0x19b   : > { %v807_v18 = vsel %vm775_vm5, %v740_v63, %v791_v9  ;;  %v813_v60 = vsel %vm781_vm11, %v755_v31, %v797_v39  ;;  %v924_v63 = vmul.f32 %v879_v30, %v812_v43 }
 0x19c   : > { %v1580_v52 = vpop.f32.mrf.mxu2  ;;  %v919_v24 = vmul.f32 %v854_v56, %v807_v18  ;;  %v798_v56 = vmul.f32 0.01, %v758_v49 }
 0x19d   : > { %v760_v54 = vadd.f32 %v1580_v52, %v1570_v42 }
 0x19e   : > { %v742_v53 = vpop.f32.mrf.mxu1  ;;  %v814_v5 = vsel %vm782_vm12, %v758_v49, %v798_v56 }
 0x19f   : > { %v743_v8 = vadd.f32 %v742_v53, %v618_v32  ;;  %vm783_vm13 = vcmp.gt.f32.partialorder %v760_v54, 0.0 }
 0x1a1   : > { %v792_v14 = vmul.f32 0.01, %v743_v8  ;;  %vm776_vm6 = vcmp.gt.f32.partialorder %v743_v8, 0.0 }
 0x1a3   : > { %v808_v7 = vsel %vm776_vm6, %v743_v8, %v792_v14 }
 0x1a4   : > { %v1582_v58 = vpop.f32.mrf.mxu2  ;;  %v920_v28 = vmul.f32 %v859_v2, %v808_v7  ;;  %v894_v2 = vpop.permute.xlu1 %893 }
 0x1a5   : > { %v763_v57 = vadd.f32 %v1582_v58, %v1572_v44  ;;  %v899_v58 = vpop.permute.xlu2 %898 }
 0x1a6   : > { %v744_v61 = vpop.f32.mrf.mxu1 }
 0x1a7   : > { %v745_v0 = vadd.f32 %v744_v61, %v623_v33  ;;  %v934_v33 = vadd.f32 %v933_v27, %v919_v24  ;;  %v799_v61 = vmul.f32 0.01, %v760_v54  ;;  %v800_v6 = vmul.f32 0.01, %v763_v57 }
 0x1a8   : > { %vm784_vm14 = vcmp.gt.f32.partialorder %v763_v57, 0.0 }
 0x1a9   : > { %v793_v17 = vmul.f32 0.01, %v745_v0  ;;  %vm777_vm7 = vcmp.gt.f32.partialorder %v745_v0, 0.0  ;;  %v935_v53 = vadd.f32 %v934_v33, %v920_v28  ;;  %v815_v3 = vsel %vm783_vm13, %v760_v54, %v799_v61 }
 0x1aa   : > { %v927_v13 = vmul.f32 %v894_v2, %v815_v3 }
 0x1ab   : > { %v809_v26 = vsel %vm777_vm7, %v745_v0, %v793_v17  ;;  %v904_v17 = vpop.permute.xlu0 %903 }
 0x1ac   : > { %v764_v4 = vpop.f32.mrf.mxu2  ;;  %v909_v7 = vpop.permute.xlu1 %908 }
 0x1ad   : > { %v765_v62 = vadd.f32 %v764_v4, %v1574_v46  ;;  %v816_v4 = vsel %vm784_vm14, %v763_v57, %v800_v6  ;;  %v914_v24 = vpop.permute.xlu2 %913 }
 0x1ae   : > { %v747_v16 = vpop.f32.mrf.mxu1  ;;  %v928_v18 = vmul.f32 %v899_v58, %v816_v4 }
 0x1af   : > { %v748_v19 = vadd.f32 %v747_v16, %v628_v34  ;;  %v921_v34 = vmul.f32 %v864_v1, %v809_v26  ;;  %v925_v1 = vmul.f32 %v884_v41, %v813_v60  ;;  %v801_v9 = vmul.f32 0.01, %v765_v62 }
 0x1b0   : > { %vm785_vm15 = vcmp.gt.f32.partialorder %v765_v62, 0.0 }
 0x1b1   : > { %v794_v11 = vmul.f32 0.01, %v748_v19  ;;  %vm778_vm8 = vcmp.gt.f32.partialorder %v748_v19, 0.0  ;;  %v936_v38 = vadd.f32 %v935_v53, %v921_v34  ;;  %v817_v15 = vsel %vm785_vm15, %v765_v62, %v801_v9 }
 0x1b2   : > { %v929_v21 = vmul.f32 %v904_v17, %v817_v15 }
 0x1b3   : > { %v810_v32 = vsel %vm778_vm8, %v748_v19, %v794_v11 }
 0x1b4   : > { %v767_v29 = vpop.f32.mrf.mxu2  ;;  %v922_v37 = vmul.f32 %v869_v10, %v810_v32  ;;  %v926_v10 = vmul.f32 %v889_v47, %v814_v5  ;;  %v954_v32 = vstv %s953_s9 }
 0x1b5   : > { %v768_v8 = vadd.f32 %v767_v29, %v1576_v48 }
 0x1b6   : > { %v749_v36 = vpop.f32.mrf.mxu1  ;;  %v937_v40 = vadd.f32 %v936_v38, %v922_v37 }
 0x1b7   : > { %v750_v51 = vadd.f32 %v749_v36, %v1564_v35  ;;  %v802_v12 = vmul.f32 0.01, %v768_v8  ;;  %vm786_vm0 = vcmp.gt.f32.partialorder %v768_v8, 0.0 }
 0x1b9   : > { %vm779_vm10 = vcmp.gt.f32.partialorder %v750_v51, 0.0  ;;  %v795_v55 = vmul.f32 0.01, %v750_v51  ;;  %v818_v19 = vsel %vm786_vm0, %v768_v8, %v802_v12 }
 0x1bb   : > { %v811_v59 = vsel %vm779_vm10, %v750_v51, %v795_v55 }
 0x1bc   : > { %v923_v35 = vmul.f32 %v874_v25, %v811_v59  ;;  %v769_v52 = vpop.f32.mrf.mxu2 }
 0x1bd   : > { %v770_v0 = vadd.f32 %v769_v52, %v1578_v50  ;;  %v930_v50 = vmul.f32 %v909_v7, %v818_v19 }
 0x1be   : > { %v938_v42 = vadd.f32 %v937_v40, %v923_v35 }
 0x1bf   : > { %v803_v16 = vmul.f32 0.01, %v770_v0  ;;  %vm787_vm1 = vcmp.gt.f32.partialorder %v770_v0, 0.0 }
 0x1c0   : > { %v939_v44 = vadd.f32 %v938_v42, %v924_v63 }
 0x1c1   : > { %v819_v11 = vsel %vm787_vm1, %v770_v0, %v803_v16 }
 0x1c2   : > { %v940_v46 = vadd.f32 %v939_v44, %v925_v1  ;;  %v931_v25 = vmul.f32 %v914_v24, %v819_v11 }
 0x1c4   : > { %v941_v14 = vadd.f32 %v940_v46, %v926_v10 }
 0x1c6   : > { %v942_v48 = vadd.f32 %v941_v14, %v927_v13 }
 0x1c8   : > { %v943_v22 = vadd.f32 %v942_v48, %v928_v18 }
 0x1ca   : > { %v944_v23 = vadd.f32 %v943_v22, %v929_v21 }
 0x1cc   : > { %v945_v20 = vadd.f32 %v944_v23, %v930_v50 }
 0x1ce   : > { %v946_v26 = vadd.f32 %v945_v20, %v931_v25 }
 0x1d0   : > { %v947_v27 = vrot.slane %v946_v26, 4 }
 0x1d2   : > { %v948_v28 = vadd.f32 %v947_v27, %v946_v26 }
 0x1d4   : > { %v949_v29 = vrot.slane %v948_v28, 2 }
 0x1d6   : > { %v950_v30 = vadd.f32 %v949_v29, %v948_v28 }
 0x1d8   : > { %v951_v31 = vrot.slane %v950_v30, 1 }
 0x1da   : > { %v952_v33 = vadd.f32 %v951_v31, %v950_v30 }
 0x1dc   : > { %v955_v34 = vadd.f32 %v954_v32, %v952_v33 }
 0x1de   : > { %v956_v36 = vmul.f32 %v955_v34, %v955_v34 }
 0x1e0   : > { %v957_v41 = vsub.f32 0.0, %v956_v36 }
 0x1e2   : > { %1176 = vtanh.f32 %v957_v41 }
 0x1e8   : > { %v1177_v45 = vpop.eup %1176 }
 0x1e9   : > { %v959_v49 = vmul.f32 -5000.0, %v1177_v45 }
 0x1eb   : > { %960 = vst [vmem:[%s269_s17] sm:$0x1] %v959_v49 }
 0x1ec   : > { %1205 = shalt.err (!%p1202_p3)
}
 0x1ed   : > { %1133 = dma.vmem_to_hbm [thread:$0]  (%p1324_p5), %s973_s18, 16, %s975_s19, %s962_s20  }
 0x1ee PF: > { %p1139_p4 = scmp.ge.s32.totalorder %s1240_s29, 2  ;;  %s986_s9 = sand.u32 1, %s1228_s26  }
 0x1ef   : > { %s987_s10 = scalar_lea.sflag [#allocation4], %s986_s9 }
 0x1f0   : > { %p1136_p7 = pnand %p1139_p4, %p1328_p6 }
 0x1f2   : > { %p1137_p8 = pneg %p1136_p7 }
 0x1f4   : > { %1223 = dma.done.wait (%p1137_p8), %s987_s10, 16  }
 0x1f5   : > { %1225 = vsyncadd (%p1137_p8), %s987_s10, 4294967280  ;;  %p18_p9 = scmp.ge.s32.totalorder %s1311_s8, 4   ;;  %s1636_s26 = smov %s1232_s27 }
 0x1f6   : > { %s1637_s27 = smov %s1236_s28  ;;  %s1638_s28 = smov %s1322_s11 }
 0x1f7   : > { %s1639_s29 = smov %s1311_s8  ;;  %20 = sbr.rel (!%p18_p9) target bundleno = 5 (0x5), region = 83 }
 0x1fc   :  { %992 = vsyncpa [#allocation4], 1 }
 0x1fd   :  { %994 = vsyncpa [#allocation4 + $0x1], 1 }

</bundles_post_ra>
